<compile_context>
chip_gen: v6e
topology: v6e:2x2x1
jax: 0.10.0
libtpu: 0.0.40
codegen_flags: <defaults>
</compile_context>

<pallas_src>
import jax
import jax.numpy as jnp
from jax.experimental import pallas as pl
from jax.experimental.pallas import tpu as pltpu


def mlp_kernel(x_ref, w1_ref, b1_ref, w2_ref, b2_ref, out_ref):
    # x_ref: (TB, 784)  w1_ref: (784, 128)  b1_ref: (1, 128) f32
    # w2_ref: (128, 10) b2_ref: (1, 10) f32  out_ref: (TB, 10) f32

    # ---- hidden layer: Linear(784 -> 128), f32 accumulation on the MXU ----
    h = jnp.dot(x_ref[...], w1_ref[...], preferred_element_type=jnp.float32)
    h = h + b1_ref[...]                     # (TB,128) + (1,128) broadcast

    # ---- sigmoid via EUP (exp + approx reciprocal), no f32 VALU divide ----
    e = jnp.exp(-h)
    s = pl.reciprocal(1.0 + e, approx=True)

    # ---- output layer: Linear(128 -> 10) ----
    logits = jnp.dot(s.astype(w2_ref.dtype), w2_ref[...],
                     preferred_element_type=jnp.float32)
    logits = logits + b2_ref[...]           # (TB,10) + (1,10) broadcast

    # ---- log_softmax along dim=1 (numerically stable) ----
    m = jnp.max(logits, axis=-1, keepdims=True)
    shifted = logits - m
    lse = jnp.log(jnp.sum(jnp.exp(shifted), axis=-1, keepdims=True))
    out_ref[...] = (shifted - lse).astype(out_ref.dtype)


def _pick_batch_tile(B, block_b):
    """Batch tile: full block for small B; otherwise as large as block_b while
    keeping >= 4 grid steps (2 per v7x TensorCore) so per-core prefetch overlap
    and megacore sharding both survive.  Rounded to a multiple of 256."""
    if B <= 512:
        return B                              # single full block (exact dim ok)
    tb = min(block_b, max(256, pl.cdiv(B, 4)))
    tb = max(256, (tb // 256) * 256)          # sublane/MXU-friendly multiple
    return min(tb, B)


def net_forward(x, w1, b1, w2, b2, *, block_b=1024, x_buffers=2):
    """x: (B, 784). Returns (B, 10) float32 log-probabilities.

    The matmul input dtype follows x.dtype: pass x already in bf16 (produced
    upstream, no extra HBM round trip) to halve the memory-bound x traffic on
    v6e/v7x.  Weights are cast to match (tiny, ~0.4 MiB one-time); biases,
    MXU accumulation and the softmax stay f32.
    """
    B, K = x.shape
    H = w1.shape[1]
    C = w2.shape[1]

    compute_dtype = x.dtype
    w1 = w1.astype(compute_dtype)
    w2 = w2.astype(compute_dtype)
    b1 = b1.astype(jnp.float32)
    b2 = b2.astype(jnp.float32)

    tb = _pick_batch_tile(B, block_b)
    grid = (pl.cdiv(B, tb),)

    flops = 2 * B * (K * H + H * C)
    transcendentals = B * (2 * H + C + 1)      # sigmoid exp+recip, softmax exp+log
    bytes_accessed = int(
        x.size * x.dtype.itemsize
        + w1.size * w1.dtype.itemsize
        + w2.size * w2.dtype.itemsize
        + b1.size * 4 + b2.size * 4
        + B * C * 4)

    # x is the only streamed operand; optionally deepen its pipeline if a trace
    # shows exposed DMA waits.  Weights/biases keep constant index_maps (resident).
    if x_buffers > 2:
        x_spec = pl.BlockSpec((tb, K), lambda i: (i, 0),
                              pipeline_mode=pl.Buffered(x_buffers))
    else:
        x_spec = pl.BlockSpec((tb, K), lambda i: (i, 0))

    return pl.pallas_call(
        mlp_kernel,
        out_shape=jax.ShapeDtypeStruct((B, C), jnp.float32),
        grid=grid,
        in_specs=[
            x_spec,                                    # x: streamed, double-buffered
            pl.BlockSpec((K, H), lambda i: (0, 0)),    # W1: resident across grid
            pl.BlockSpec((1, H), lambda i: (0, 0)),    # b1: resident
            pl.BlockSpec((H, C), lambda i: (0, 0)),    # W2: resident
            pl.BlockSpec((1, C), lambda i: (0, 0)),    # b2: resident
        ],
        out_specs=pl.BlockSpec((tb, C), lambda i: (i, 0)),
        compiler_params=pltpu.CompilerParams(
            dimension_semantics=("parallel",),         # shard batch tiles across TCs
            # ~13 MiB of double-buffered x at tb=2048 f32 + weights/out; 32 MiB
            # clears v5e's 16 MiB default scoped limit with headroom, and is
            # within every chip's physical VMEM (v7x: 64 MiB).
            vmem_limit_bytes=32 * 1024 * 1024),
        cost_estimate=pl.CostEstimate(
            flops=flops,
            transcendentals=transcendentals,
            bytes_accessed=bytes_accessed),
    )(x, w1, b1, w2, b2)


def init_params(key):
    """PyTorch-style Linear init: U(-1/sqrt(fan_in), 1/sqrt(fan_in)).

    Weights stored as (in_features, out_features) so the kernel does x @ W."""
    k1, k2, k3, k4 = jax.random.split(key, 4)
    bound1 = 1.0 / jnp.sqrt(784.0)
    bound2 = 1.0 / jnp.sqrt(128.0)
    w1 = jax.random.uniform(k1, (784, 128), jnp.float32, -bound1, bound1)
    b1 = jax.random.uniform(k2, (1, 128), jnp.float32, -bound1, bound1)
    w2 = jax.random.uniform(k3, (128, 10), jnp.float32, -bound2, bound2)
    b2 = jax.random.uniform(k4, (1, 10), jnp.float32, -bound2, bound2)
    return w1, b1, w2, b2


def reference_forward(x, w1, b1, w2, b2):
    h = jax.nn.sigmoid(x.astype(jnp.float32) @ w1 + b1)
    return jax.nn.log_softmax(h @ w2 + b2, axis=1)


if __name__ == "__main__":
    key = jax.random.PRNGKey(0)
    kx, kp = jax.random.split(key)
    w1, b1, w2, b2 = init_params(kp)

    # ---- Case 1: small batch, single full block, f32 ----
    Bs = 8
    xs = jax.random.normal(kx, (Bs, 784), jnp.float32)
    out_s = jax.block_until_ready(net_forward(xs, w1, b1, w2, b2))
    ref_s = reference_forward(xs, w1, b1, w2, b2)
    assert out_s.shape == (Bs, 10)
    # approx-reciprocal sigmoid (EUP) is slightly looser than an exact divide
    assert jnp.allclose(out_s, ref_s, atol=1e-2, rtol=1e-3), "small f32 mismatch"
    assert jnp.allclose(jnp.sum(jnp.exp(out_s), axis=1), 1.0, atol=1e-5)

    # ---- Case 2: gridded path (B=2048 -> tb=512, grid=(4,), parallel), f32 ----
    Bg = 2048
    xg = jax.random.normal(kx, (Bg, 784), jnp.float32)
    out_g = jax.block_until_ready(net_forward(xg, w1, b1, w2, b2, block_b=1024))
    ref_g = reference_forward(xg, w1, b1, w2, b2)
    assert out_g.shape == (Bg, 10)
    assert jnp.allclose(out_g, ref_g, atol=1e-2, rtol=1e-3), "gridded f32 mismatch"
    assert jnp.allclose(jnp.sum(jnp.exp(out_g), axis=1), 1.0, atol=1e-5)

    # ---- Case 3: bf16 x handed over directly (caller-side contract, no wrapper cast) ----
    x_bf16 = jax.random.normal(kx, (Bs, 784), jnp.bfloat16)
    out_bf16 = jax.block_until_ready(net_forward(x_bf16, w1, b1, w2, b2))
    ref_bf16 = reference_forward(x_bf16, w1, b1, w2, b2)
    assert out_bf16.shape == (Bs, 10)
    assert jnp.allclose(out_bf16, ref_bf16, atol=3e-2, rtol=3e-2), "bf16 mismatch"
    assert jnp.allclose(jnp.sum(jnp.exp(out_bf16), axis=1), 1.0, atol=1e-3)

    print("KERNEL_OK")
</pallas_src>

<mosaic_0001>
module attributes {stable_mosaic.version = 11 : i64} {
  func.func @mlp_kernel(%arg0: i32, %arg1: memref<8x784xf32, #tpu.memory_space<vmem>>, %arg2: memref<784x128xf32, #tpu.memory_space<vmem>>, %arg3: memref<1x128xf32, #tpu.memory_space<vmem>>, %arg4: memref<128x10xf32, #tpu.memory_space<vmem>>, %arg5: memref<1x10xf32, #tpu.memory_space<vmem>>, %arg6: memref<8x10xf32, #tpu.memory_space<vmem>>) attributes {dimension_semantics = [#tpu.dimension_semantics<parallel>], iteration_bounds = array<i64: 1>, scalar_prefetch = 0 : i64, scratch_operands = 0 : i64, tpu.core_type = #tpu.core_type<tc>, window_params = [{transform_indices = @transform_0, window_bounds = array<i64: 8, 784>}, {pipeline_mode = #tpu.pipeline_mode<synchronous>, transform_indices = @transform_1, window_bounds = array<i64: 784, 128>}, {pipeline_mode = #tpu.pipeline_mode<synchronous>, transform_indices = @transform_2, window_bounds = array<i64: 1, 128>}, {pipeline_mode = #tpu.pipeline_mode<synchronous>, transform_indices = @transform_3, window_bounds = array<i64: 128, 10>}, {pipeline_mode = #tpu.pipeline_mode<synchronous>, transform_indices = @transform_4, window_bounds = array<i64: 1, 10>}, {transform_indices = @transform_5, window_bounds = array<i64: 8, 10>}]} {
    %c0 = arith.constant 0 : index
    %c0_0 = arith.constant 0 : index
    %0 = vector.load %arg1[%c0, %c0_0] : memref<8x784xf32, #tpu.memory_space<vmem>>, vector<8x784xf32>
    %c0_1 = arith.constant 0 : index
    %c0_2 = arith.constant 0 : index
    %1 = vector.load %arg2[%c0_1, %c0_2] : memref<784x128xf32, #tpu.memory_space<vmem>>, vector<784x128xf32>
    %cst = arith.constant dense<0.000000e+00> : vector<8x128xf32>
    %2 = tpu.matmul %0, %1, %cst {dimension_numbers = #tpu.dot_dimension_numbers<[1], [0], [0], [1], [0, 0, 1, 1], [], []>} : vector<8x784xf32>, vector<784x128xf32>, vector<8x128xf32> -> vector<8x128xf32>
    %c0_3 = arith.constant 0 : index
    %c0_4 = arith.constant 0 : index
    %3 = vector.load %arg3[%c0_3, %c0_4] : memref<1x128xf32, #tpu.memory_space<vmem>>, vector<1x128xf32>
    %4 = vector.broadcast %3 : vector<1x128xf32> to vector<8x128xf32>
    %5 = arith.addf %2, %4 : vector<8x128xf32>
    %cst_5 = arith.constant 0.000000e+00 : f32
    %6 = vector.broadcast %cst_5 : f32 to vector<8x128xf32>
    %7 = arith.subf %6, %5 : vector<8x128xf32>
    %8 = math.exp %7 : vector<8x128xf32>
    %cst_6 = arith.constant 1.000000e+00 : f32
    %9 = vector.broadcast %cst_6 : f32 to vector<8x128xf32>
    %10 = arith.addf %9, %8 : vector<8x128xf32>
    %11 = tpu.reciprocal %10 {approx = true} : vector<8x128xf32> -> vector<8x128xf32>
    %c0_7 = arith.constant 0 : index
    %c0_8 = arith.constant 0 : index
    %12 = vector.load %arg4[%c0_7, %c0_8] : memref<128x10xf32, #tpu.memory_space<vmem>>, vector<128x10xf32>
    %cst_9 = arith.constant dense<0.000000e+00> : vector<8x10xf32>
    %13 = tpu.matmul %11, %12, %cst_9 {dimension_numbers = #tpu.dot_dimension_numbers<[1], [0], [0], [1], [0, 0, 1, 1], [], []>} : vector<8x128xf32>, vector<128x10xf32>, vector<8x10xf32> -> vector<8x10xf32>
    %c0_10 = arith.constant 0 : index
    %c0_11 = arith.constant 0 : index
    %14 = vector.load %arg5[%c0_10, %c0_11] : memref<1x10xf32, #tpu.memory_space<vmem>>, vector<1x10xf32>
    %15 = vector.broadcast %14 : vector<1x10xf32> to vector<8x10xf32>
    %16 = arith.addf %13, %15 : vector<8x10xf32>
    %cst_12 = arith.constant dense<0xFF800000> : vector<8xf32>
    %17 = vector.multi_reduction <maximumf>, %16, %cst_12 [1] : vector<8x10xf32> to vector<8xf32>
    %18 = vector.shape_cast %17 : vector<8xf32> to vector<8x1xf32>
    %19 = vector.broadcast %18 : vector<8x1xf32> to vector<8x10xf32>
    %20 = arith.subf %16, %19 : vector<8x10xf32>
    %21 = math.exp %20 : vector<8x10xf32>
    %cst_13 = arith.constant dense<0.000000e+00> : vector<8xf32>
    %22 = vector.multi_reduction <add>, %21, %cst_13 [1] : vector<8x10xf32> to vector<8xf32>
    %23 = vector.shape_cast %22 : vector<8xf32> to vector<8x1xf32>
    %24 = math.log %23 : vector<8x1xf32>
    %25 = vector.broadcast %24 : vector<8x1xf32> to vector<8x10xf32>
    %26 = arith.subf %20, %25 : vector<8x10xf32>
    %c0_14 = arith.constant 0 : index
    %c0_15 = arith.constant 0 : index
    %27 = vector.load %arg6[%c0_14, %c0_15] : memref<8x10xf32, #tpu.memory_space<vmem>>, vector<8x10xf32>
    tpu.vector_store %arg6[%c0_14, %c0_15], %26 {strides = array<i32>} : memref<8x10xf32, #tpu.memory_space<vmem>>, vector<8x10xf32>,
    return
  }
  func.func @transform_0(%arg0: i32) -> (i32, i32) {
    %c0_i32 = arith.constant 0 : i32
    %c0_i32_0 = arith.constant 0 : i32
    return %arg0, %c0_i32 : i32, i32
  }
  func.func @transform_1(%arg0: i32) -> (i32, i32) {
    %c0_i32 = arith.constant 0 : i32
    %c0_i32_0 = arith.constant 0 : i32
    %c0_i32_1 = arith.constant 0 : i32
    return %c0_i32, %c0_i32_0 : i32, i32
  }
  func.func @transform_2(%arg0: i32) -> (i32, i32) {
    %c0_i32 = arith.constant 0 : i32
    %c0_i32_0 = arith.constant 0 : i32
    %c0_i32_1 = arith.constant 0 : i32
    return %c0_i32, %c0_i32_0 : i32, i32
  }
  func.func @transform_3(%arg0: i32) -> (i32, i32) {
    %c0_i32 = arith.constant 0 : i32
    %c0_i32_0 = arith.constant 0 : i32
    %c0_i32_1 = arith.constant 0 : i32
    return %c0_i32, %c0_i32_0 : i32, i32
  }
  func.func @transform_4(%arg0: i32) -> (i32, i32) {
    %c0_i32 = arith.constant 0 : i32
    %c0_i32_0 = arith.constant 0 : i32
    %c0_i32_1 = arith.constant 0 : i32
    return %c0_i32, %c0_i32_0 : i32, i32
  }
  func.func @transform_5(%arg0: i32) -> (i32, i32) {
    %c0_i32 = arith.constant 0 : i32
    %c0_i32_0 = arith.constant 0 : i32
    return %arg0, %c0_i32 : i32, i32
  }
}

</mosaic_0001>

<bundles_post_ra>
// kernel: tpu_custom_call.1
= control target key start
LH: loop header
LB: loop body
LE: loop exit
PB: predicated region body
PF: predicated region fallthrough
CT: control target
= control target key end

     0   :  { %10 = vsyncpa [#allocation3], 0  ;;  %s926_s0 = inlined_call_operand.vmem [shape: f32[8,784], index: 0, kind: input, shape index: {}]   ;;  %s927_s1 = inlined_call_operand.hbm [shape: f32[784,128], index: 1, kind: input, shape index: {}]   ;;  %s928_s2 = inlined_call_operand.vmem [shape: f32[1,128], index: 2, kind: input, shape index: {}]   ;;  %s929_s3 = inlined_call_operand.vmem [shape: f32[128,10], index: 3, kind: input, shape index: {}]   ;;  %s930_s4 = inlined_call_operand.vmem [shape: f32[1,10], index: 4, kind: input, shape index: {}]   ;;  %s931_s5 = inlined_call_operand.hbm [shape: f32[8,10], index: 5, kind: output, shape index: {}]  }
   0x1   :  { %11 = vsyncpa [#allocation4], 0  ;;  %s786_s18 = smov [#allocation2]  }
   0x2   :  { %s19_s19 = sshll.u32 %s786_s18, 4  ;;  %s20_s19 = int_to_ptr.vmem [resolvable:$true] %s19_s19 }
   0x3   :  { %s750_s20 = scalar_lea.vmem %s20_s19, 12544  ;;  %p755_p1 = scmp.lt.s32.totalorder %s20_s19, %s20_s19 }
   0x4   :  { %p751_p0 = scmp.ne.s32.totalorder %s20_s19, %s750_s20  ;;  %p756_p2 = scmp.lt.s32.totalorder %s750_s20, %s750_s20 }
   0x6   :  { %p757_p3 = por %p756_p2, %p755_p1 }
   0x8   :  { %p758_p4 = pnand %p757_p3, %p751_p0 }
   0xa   :  { %761 = shalt.err (!%p758_p4)
}
   0xb   :  { %s787_s21 = smov 128   ;;  %s788_s22 = smov 8  }
   0xc   :  { %25 = dma.hbm_to_vmem [thread:$0]  %s927_s1, 12544, %s20_s19, [#allocation3], %s787_s21, %s787_s21, %s788_s22  }
   0xd   :  { %782 = dma.done.wait [#allocation3], 12544  }
   0xe   :  { %783 = vsyncadd [#allocation3], 4294954752  ;;  %v73_v0 = vld [vmem:[#allocation2 + $0xf8] sm:$0xff]  ;;  %v72_v2 = vld [vmem:[#allocation2 + $0xf0] sm:$0xff]  ;;  %vm147_vm0 = vcmask 130048   ;;  %vm790_vm1 = vmmov 0  }
   0xf   :  { %v57_v1 = vld [vmem:[#allocation2 + $0x78] sm:$0xff]  ;;  %561 = vmatprep.subr.mxu0 %v73_v0  ;;  %v56_v4 = vld [vmem:[#allocation2 + $0x70] sm:$0xff]  ;;  %v71_v6 = vld [vmem:[#allocation2 + $0xe8] sm:$0xff]  ;;  %vm529_vm2 = vcmask 80896  }
  0x10   :  { %v105_v3 = vld [vmem:[#allocation2 + $0x1f8] sm:$0xff]  ;;  %562 = vmatpush3.msra.mxu0 %v57_v1  ;;  %v104_v7 = vld [vmem:[#allocation2 + $0x1f0] sm:$0xff]  ;;  %v55_v8 = vld [vmem:[#allocation2 + $0x68] sm:$0xff] }
  0x11   :  { %v89_v5 = vld [vmem:[#allocation2 + $0x178] sm:$0xff]  ;;  %596 = vmatprep.subr.mxu1 %v105_v3  ;;  %563 = vmatprep.subr.mxu0 %v72_v2  ;;  %v88_v9 = vld [vmem:[#allocation2 + $0x170] sm:$0xff]  ;;  %v103_v10 = vld [vmem:[#allocation2 + $0x1e8] sm:$0xff] }
  0x12   :  { %597 = vmatpush3.msra.mxu1 %v89_v5  ;;  %564 = vmatpush3.msra.mxu0 %v56_v4  ;;  %v70_v11 = vld [vmem:[#allocation2 + $0xe0] sm:$0xff]  ;;  %v87_v12 = vld [vmem:[#allocation2 + $0x168] sm:$0xff]  ;;  %v69_v15 = vld [vmem:[#allocation2 + $0xd8] sm:$0xff] }
  0x13   :  { %598 = vmatprep.subr.mxu1 %v104_v7  ;;  %565 = vmatprep.subr.mxu0 %v71_v6  ;;  %v54_v13 = vld [vmem:[#allocation2 + $0x60] sm:$0xff]  ;;  %v53_v17 = vld [vmem:[#allocation2 + $0x58] sm:$0xff]  ;;  %v68_v19 = vld [vmem:[#allocation2 + $0xd0] sm:$0xff] }
  0x14   :  { %599 = vmatpush3.msra.mxu1 %v88_v9  ;;  %v102_v14 = vld [vmem:[#allocation2 + $0x1e0] sm:$0xff]  ;;  %566 = vmatpush3.msra.mxu0 %v55_v8  ;;  %v101_v18 = vld [vmem:[#allocation2 + $0x1d8] sm:$0xff]  ;;  %v52_v21 = vld [vmem:[#allocation2 + $0x50] sm:$0xff] }
  0x15   :  { %600 = vmatprep.subr.mxu1 %v103_v10  ;;  %v86_v16 = vld [vmem:[#allocation2 + $0x160] sm:$0xff]  ;;  %567 = vmatprep.subr.mxu0 %v70_v11  ;;  %v85_v20 = vld [vmem:[#allocation2 + $0x158] sm:$0xff]  ;;  %v100_v22 = vld [vmem:[#allocation2 + $0x1d0] sm:$0xff] }
  0x16   :  { %601 = vmatpush3.msra.mxu1 %v87_v12  ;;  %568 = vmatpush3.msra.mxu0 %v54_v13  ;;  %v67_v23 = vld [vmem:[#allocation2 + $0xc8] sm:$0xff]  ;;  %v84_v24 = vld [vmem:[#allocation2 + $0x150] sm:$0xff]  ;;  %v66_v27 = vld [vmem:[#allocation2 + $0xc0] sm:$0xff] }
  0x17   :  { %602 = vmatprep.subr.mxu1 %v102_v14  ;;  %569 = vmatprep.subr.mxu0 %v69_v15  ;;  %v51_v25 = vld [vmem:[#allocation2 + $0x48] sm:$0xff]  ;;  %v50_v29 = vld [vmem:[#allocation2 + $0x40] sm:$0xff]  ;;  %v65_v31 = vld [vmem:[#allocation2 + $0xb8] sm:$0xff]  ;;  %v789_v14 = vmov 0.0  }
  0x18   :  { %603 = vmatpush3.msra.mxu1 %v86_v16  ;;  %570 = vmatpush3.msra.mxu0 %v53_v17  ;;  %v99_v26 = vld [vmem:[#allocation2 + $0x1c8] sm:$0xff]  ;;  %v98_v30 = vld [vmem:[#allocation2 + $0x1c0] sm:$0xff]  ;;  %v49_v33 = vld [vmem:[#allocation2 + $0x38] sm:$0xff] }
  0x19   :  { %604 = vmatprep.subr.mxu1 %v101_v18  ;;  %571 = vmatprep.subr.mxu0 %v68_v19  ;;  %v83_v28 = vld [vmem:[#allocation2 + $0x148] sm:$0xff]  ;;  %v82_v32 = vld [vmem:[#allocation2 + $0x140] sm:$0xff]  ;;  %v97_v34 = vld [vmem:[#allocation2 + $0x1b8] sm:$0xff] }
  0x1a   :  { %605 = vmatpush3.msra.mxu1 %v85_v20  ;;  %572 = vmatpush3.msra.mxu0 %v52_v21  ;;  %v64_v35 = vld [vmem:[#allocation2 + $0xb0] sm:$0xff]  ;;  %v81_v36 = vld [vmem:[#allocation2 + $0x138] sm:$0xff]  ;;  %v63_v39 = vld [vmem:[#allocation2 + $0xa8] sm:$0xff] }
  0x1b   :  { %606 = vmatprep.subr.mxu1 %v100_v22  ;;  %573 = vmatprep.subr.mxu0 %v67_v23  ;;  %v48_v37 = vld [vmem:[#allocation2 + $0x30] sm:$0xff]  ;;  %v47_v41 = vld [vmem:[#allocation2 + $0x28] sm:$0xff]  ;;  %v62_v43 = vld [vmem:[#allocation2 + $0xa0] sm:$0xff] }
  0x1c   :  { %607 = vmatpush3.msra.mxu1 %v84_v24  ;;  %574 = vmatpush3.msra.mxu0 %v51_v25  ;;  %v96_v38 = vld [vmem:[#allocation2 + $0x1b0] sm:$0xff]  ;;  %v95_v42 = vld [vmem:[#allocation2 + $0x1a8] sm:$0xff]  ;;  %v46_v45 = vld [vmem:[#allocation2 + $0x20] sm:$0xff] }
  0x1d   :  { %608 = vmatprep.subr.mxu1 %v99_v26  ;;  %575 = vmatprep.subr.mxu0 %v66_v27  ;;  %v80_v40 = vld [vmem:[#allocation2 + $0x130] sm:$0xff]  ;;  %v79_v44 = vld [vmem:[#allocation2 + $0x128] sm:$0xff]  ;;  %v94_v46 = vld [vmem:[#allocation2 + $0x1a0] sm:$0xff] }
  0x1e   :  { %609 = vmatpush3.msra.mxu1 %v83_v28  ;;  %576 = vmatpush3.msra.mxu0 %v50_v29  ;;  %v61_v47 = vld [vmem:[#allocation2 + $0x98] sm:$0xff]  ;;  %v78_v48 = vld [vmem:[#allocation2 + $0x120] sm:$0xff]  ;;  %v60_v51 = vld [vmem:[#allocation2 + $0x90] sm:$0xff] }
  0x1f   :  { %610 = vmatprep.subr.mxu1 %v98_v30  ;;  %577 = vmatprep.subr.mxu0 %v65_v31  ;;  %v45_v49 = vld [vmem:[#allocation2 + $0x18] sm:$0xff]  ;;  %v44_v53 = vld [vmem:[#allocation2 + $0x10] sm:$0xff]  ;;  %v59_v55 = vld [vmem:[#allocation2 + $0x88] sm:$0xff] }
  0x20   :  { %611 = vmatpush3.msra.mxu1 %v82_v32  ;;  %578 = vmatpush3.msra.mxu0 %v49_v33  ;;  %v93_v50 = vld [vmem:[#allocation2 + $0x198] sm:$0xff]  ;;  %v92_v54 = vld [vmem:[#allocation2 + $0x190] sm:$0xff]  ;;  %v43_v57 = vld [vmem:[#allocation2 + $0x8] sm:$0xff] }
  0x21   :  { %612 = vmatprep.subr.mxu1 %v97_v34  ;;  %579 = vmatprep.subr.mxu0 %v64_v35  ;;  %v77_v52 = vld [vmem:[#allocation2 + $0x118] sm:$0xff]  ;;  %v76_v56 = vld [vmem:[#allocation2 + $0x110] sm:$0xff]  ;;  %v91_v58 = vld [vmem:[#allocation2 + $0x188] sm:$0xff] }
  0x22   :  { %613 = vmatpush3.msra.mxu1 %v81_v36  ;;  %580 = vmatpush3.msra.mxu0 %v48_v37  ;;  %v58_v59 = vld [vmem:[#allocation2 + $0x80] sm:$0xff]  ;;  %v36_v60 = vld [vmem:[%s926_s0 + $0x8] sm:$0xff]  ;;  %v137_v1 = vld [vmem:[#allocation2 + $0x2f8] sm:$0xff] }
  0x23   :  { %614 = vmatprep.subr.mxu1 %v96_v38  ;;  %581 = vmatprep.subr.mxu0 %v63_v39  ;;  %v42_v61 = vld [vmem:[#allocation2] sm:$0xff]  ;;  %v75_v62 = vld [vmem:[#allocation2 + $0x108] sm:$0xff]  ;;  %v38_v3 = vld [vmem:[%s926_s0 + $0x18] sm:$0xff] }
  0x24   :  { %615 = vmatpush3.msra.mxu1 %v80_v40  ;;  %582 = vmatpush3.msra.mxu0 %v47_v41  ;;  %v35_v63 = vld [vmem:[%s926_s0] sm:$0xff]  ;;  %v121_v4 = vld [vmem:[#allocation2 + $0x278] sm:$0xff]  ;;  %v37_v5 = vld [vmem:[%s926_s0 + $0x10] sm:$0xff] }
  0x25   :  { %616 = vmatprep.subr.mxu1 %v95_v42  ;;  %583 = vmatprep.subr.mxu0 %v62_v43  ;;  %v90_v0 = vld [vmem:[#allocation2 + $0x180] sm:$0xff]  ;;  %v136_v6 = vld [vmem:[#allocation2 + $0x2f0] sm:$0xff]  ;;  %v40_v8 = vld [vmem:[%s926_s0 + $0x28] sm:$0xff] }
  0x26   :  { %617 = vmatpush3.msra.mxu1 %v79_v44  ;;  %584 = vmatpush3.msra.mxu0 %v46_v45  ;;  %v74_v2 = vld [vmem:[#allocation2 + $0x100] sm:$0xff]  ;;  %v120_v7 = vld [vmem:[#allocation2 + $0x270] sm:$0xff]  ;;  %v135_v9 = vld [vmem:[#allocation2 + $0x2e8] sm:$0xff] }
  0x27   :  { %618 = vmatprep.subr.mxu1 %v94_v46  ;;  %585 = vmatprep.subr.mxu0 %v61_v47  ;;  %v119_v10 = vld [vmem:[#allocation2 + $0x268] sm:$0xff]  ;;  %v134_v12 = vld [vmem:[#allocation2 + $0x2e0] sm:$0xff]  ;;  %v133_v16 = vld [vmem:[#allocation2 + $0x2d8] sm:$0xff] }
  0x28   :  { %619 = vmatpush3.msra.mxu1 %v78_v48  ;;  %586 = vmatpush3.msra.mxu0 %v45_v49  ;;  %v139_v11 = vld [vmem:[#allocation2 + $0x308] sm:$0xff]  ;;  %v118_v13 = vld [vmem:[#allocation2 + $0x260] sm:$0xff]  ;;  %v117_v17 = vld [vmem:[#allocation2 + $0x258] sm:$0xff] }
  0x29   :  { %620 = vmatprep.subr.mxu1 %v93_v50  ;;  %587 = vmatprep.subr.mxu0 %v60_v51  ;;  %v138_v15 = vld [vmem:[#allocation2 + $0x300] sm:$0xff]  ;;  %v41_v18 = vld [vmem:[%s926_s0 + $0x30] sm:$0xff]  ;;  %v131_v21 = vld [vmem:[#allocation2 + $0x2c8] sm:$0xff] }
  0x2a   :  { %621 = vmatpush3.msra.mxu1 %v77_v52  ;;  %588 = vmatpush3.msra.mxu0 %v44_v53  ;;  %v132_v19 = vld [vmem:[#allocation2 + $0x2d0] sm:$0xff]  ;;  %v115_v22 = vld [vmem:[#allocation2 + $0x248] sm:$0xff]  ;;  %v130_v23 = vld [vmem:[#allocation2 + $0x2c0] sm:$0xff] }
  0x2b   :  { %622 = vmatprep.subr.mxu1 %v92_v54  ;;  %589 = vmatprep.subr.mxu0 %v59_v55  ;;  %v116_v20 = vld [vmem:[#allocation2 + $0x250] sm:$0xff]  ;;  %v114_v24 = vld [vmem:[#allocation2 + $0x240] sm:$0xff]  ;;  %v129_v25 = vld [vmem:[#allocation2 + $0x2b8] sm:$0xff] }
  0x2c   :  { %623 = vmatpush3.msra.mxu1 %v76_v56  ;;  %590 = vmatpush3.msra.mxu0 %v43_v57  ;;  %v113_v26 = vld [vmem:[#allocation2 + $0x238] sm:$0xff]  ;;  %v128_v27 = vld [vmem:[#allocation2 + $0x2b0] sm:$0xff]  ;;  %v127_v29 = vld [vmem:[#allocation2 + $0x2a8] sm:$0xff] }
  0x2d   :  { %624 = vmatprep.subr.mxu1 %v91_v58  ;;  %591 = vmatprep.subr.mxu0 %v58_v59  ;;  %v112_v28 = vld [vmem:[#allocation2 + $0x230] sm:$0xff]  ;;  %v111_v30 = vld [vmem:[#allocation2 + $0x228] sm:$0xff]  ;;  %v126_v31 = vld [vmem:[#allocation2 + $0x2a0] sm:$0xff] }
  0x2e   :  { %215 = vmatprep.mubr.f32.mxu0 %v36_v60  ;;  %592 = vmatpush3.msra.mxu0 %v42_v61  ;;  %v110_v32 = vld [vmem:[#allocation2 + $0x220] sm:$0xff]  ;;  %v125_v33 = vld [vmem:[#allocation2 + $0x298] sm:$0xff]  ;;  %v124_v35 = vld [vmem:[#allocation2 + $0x290] sm:$0xff] }
  0x2f   :  { %625 = vmatpush3.msra.mxu1 %v75_v62  ;;  %216 = vmatmul.mubr.f32.vlgmr.msra.gmra.mxu0 %v35_v63  ;;  %v109_v34 = vld [vmem:[#allocation2 + $0x218] sm:$0xff]  ;;  %v108_v36 = vld [vmem:[#allocation2 + $0x210] sm:$0xff]  ;;  %v123_v37 = vld [vmem:[#allocation2 + $0x288] sm:$0xff] }
  0x30   :  { %626 = vmatprep.subr.mxu1 %v90_v0  ;;  %631 = vmatprep.subr.mxu0 %v137_v1  ;;  %v107_v38 = vld [vmem:[#allocation2 + $0x208] sm:$0xff]  ;;  %v122_v39 = vld [vmem:[#allocation2 + $0x280] sm:$0xff]  ;;  %v451_v42 = vld [vmem:[%s929_s3 + $0x78] sm:$0xff] }
  0x31   :  { %627 = vmatpush3.msra.mxu1 %v74_v2  ;;  %285 = vmatprep.mubr.f32.mxu1 %v38_v3  ;;  %v106_v40 = vld [vmem:[#allocation2 + $0x200] sm:$0xff]  ;;  %v450_v43 = vld [vmem:[%s929_s3 + $0x70] sm:$0xff]  ;;  %v449_v44 = vld [vmem:[%s929_s3 + $0x68] sm:$0xff] }
  0x32   :  { %632 = vmatpush3.msra.mxu0 %v121_v4  ;;  %286 = vmatmul.mubr.f32.vlgmr.msra.gmra.mxu1 %v37_v5  ;;  %v39_v41 = vld [vmem:[%s926_s0 + $0x20] sm:$0xff]  ;;  %v447_v46 = vld [vmem:[%s929_s3 + $0x58] sm:$0xff]  ;;  %v446_v47 = vld [vmem:[%s929_s3 + $0x50] sm:$0xff] }
  0x33   :  { %633 = vmatprep.subr.mxu0 %v136_v6  ;;  %355 = vmatprep.mubr.f32.mxu0 %v40_v8  ;;  %v448_v45 = vld [vmem:[%s929_s3 + $0x60] sm:$0xff]  ;;  %v445_v48 = vld [vmem:[%s929_s3 + $0x48] sm:$0xff]  ;;  %v443_v50 = vld [vmem:[%s929_s3 + $0x38] sm:$0xff] }
  0x34   :  { %634 = vmatpush3.msra.mxu0 %v120_v7  ;;  %686 = vmatprep.subr.mxu1 %v789_v14  ;;  %v444_v49 = vld [vmem:[%s929_s3 + $0x40] sm:$0xff]  ;;  %v442_v51 = vld [vmem:[%s929_s3 + $0x30] sm:$0xff]  ;;  %v441_v52 = vld [vmem:[%s929_s3 + $0x28] sm:$0xff] }
  0x35   :  { %635 = vmatprep.subr.mxu0 %v135_v9  ;;  %687 = vmatpush3.msra.mxu1 %v139_v11  ;;  %v440_v53 = vld [vmem:[%s929_s3 + $0x20] sm:$0xff]  ;;  %v439_v54 = vld [vmem:[%s929_s3 + $0x18] sm:$0xff]  ;;  %v438_v55 = vld [vmem:[%s929_s3 + $0x10] sm:$0xff] }
  0x36   :  { %636 = vmatpush3.msra.mxu0 %v119_v10  ;;  %688 = vmatprep.subr.mxu1 %v789_v14  ;;  %v437_v56 = vld [vmem:[%s929_s3 + $0x8] sm:$0xff]  ;;  %v436_v57 = vld [vmem:[%s929_s3] sm:$0xff] }
  0x37   :  { %637 = vmatprep.subr.mxu0 %v134_v12  ;;  %689 = vmatpush3.msra.mxu1 %v138_v15  ;;  %v558_v1 = vld [vmem:[%s928_s2] ss:$0 sm:$0xff]  ;;  %s791_s2 = smov [#allocation5]  }
  0x38   :  { %638 = vmatpush3.msra.mxu0 %v118_v13  ;;  %690 = vmatprep.mubr.msk.f32.mxu1 %vm790_vm1, %v789_v14  ;;  %v560_v15 = vld [vmem:[%s930_s4] ss:$0 sm:$0xff]  ;;  %s549_s4 = sshll.u32 %s791_s2, 4  ;;  %s550_s4 = int_to_ptr.vmem [resolvable:$true] %s549_s4 }
  0x39   :  { %639 = vmatprep.subr.mxu0 %v133_v16  ;;  %691 = vmatmul.mubr.msk.f32.vlgmr.msra.gmra.mxu1 %vm147_vm0, %v41_v18  ;;  %s762_s20 = scalar_lea.vmem %s550_s4, 128  ;;  %p767_p6 = scmp.lt.s32.totalorder %s550_s4, %s550_s4 }
  0x3a   :  { %640 = vmatpush3.msra.mxu0 %v117_v17  ;;  %693 = vmatprep.subr.mxu1 %v789_v14  ;;  %p763_p5 = scmp.ne.s32.totalorder %s550_s4, %s762_s20  ;;  %p768_p7 = scmp.lt.s32.totalorder %s762_s20, %s762_s20 }
  0x3b   :  { %641 = vmatprep.subr.mxu0 %v132_v19  ;;  %725 = vmatprep.mubr.msk.f32.mxu1 %vm790_vm1, %v789_v14 }
  0x3c   :  { %642 = vmatpush3.msra.mxu0 %v116_v20  ;;  %694 = vmatpush3.msra.mxu1 %v451_v42  ;;  %p769_p8 = por %p768_p7, %p767_p6 }
  0x3d   :  { %643 = vmatprep.subr.mxu0 %v131_v21  ;;  %695 = vmatprep.subr.mxu1 %v789_v14 }
  0x3e   :  { %644 = vmatpush3.msra.mxu0 %v115_v22  ;;  %696 = vmatpush3.msra.mxu1 %v450_v43  ;;  %p770_p9 = pnand %p769_p8, %p763_p5 }
  0x3f   :  { %645 = vmatprep.subr.mxu0 %v130_v23  ;;  %697 = vmatprep.subr.mxu1 %v789_v14 }
  0x40   :  { %646 = vmatpush3.msra.mxu0 %v114_v24  ;;  %698 = vmatpush3.msra.mxu1 %v449_v44 }
  0x41   :  { %647 = vmatprep.subr.mxu0 %v129_v25  ;;  %699 = vmatprep.subr.mxu1 %v789_v14 }
  0x42   :  { %648 = vmatpush3.msra.mxu0 %v113_v26  ;;  %700 = vmatpush3.msra.mxu1 %v448_v45 }
  0x43   :  { %649 = vmatprep.subr.mxu0 %v128_v27  ;;  %701 = vmatprep.subr.mxu1 %v789_v14 }
  0x44   :  { %650 = vmatpush3.msra.mxu0 %v112_v28  ;;  %702 = vmatpush3.msra.mxu1 %v447_v46 }
  0x45   :  { %651 = vmatprep.subr.mxu0 %v127_v29  ;;  %703 = vmatprep.subr.mxu1 %v789_v14 }
  0x46   :  { %652 = vmatpush3.msra.mxu0 %v111_v30  ;;  %704 = vmatpush3.msra.mxu1 %v446_v47 }
  0x47   :  { %653 = vmatprep.subr.mxu0 %v126_v31  ;;  %705 = vmatprep.subr.mxu1 %v789_v14 }
  0x48   :  { %654 = vmatpush3.msra.mxu0 %v110_v32  ;;  %706 = vmatpush3.msra.mxu1 %v445_v48 }
  0x49   :  { %655 = vmatprep.subr.mxu0 %v125_v33  ;;  %707 = vmatprep.subr.mxu1 %v789_v14 }
  0x4a   :  { %656 = vmatpush3.msra.mxu0 %v109_v34  ;;  %708 = vmatpush3.msra.mxu1 %v444_v49 }
  0x4b   :  { %657 = vmatprep.subr.mxu0 %v124_v35  ;;  %709 = vmatprep.subr.mxu1 %v789_v14 }
  0x4c   :  { %658 = vmatpush3.msra.mxu0 %v108_v36  ;;  %710 = vmatpush3.msra.mxu1 %v443_v50 }
  0x4d   :  { %659 = vmatprep.subr.mxu0 %v123_v37  ;;  %711 = vmatprep.subr.mxu1 %v789_v14 }
  0x4e   :  { %660 = vmatpush3.msra.mxu0 %v107_v38  ;;  %712 = vmatpush3.msra.mxu1 %v442_v51 }
  0x4f   :  { %661 = vmatprep.subr.mxu0 %v122_v39  ;;  %713 = vmatprep.subr.mxu1 %v789_v14 }
  0x50   :  { %662 = vmatpush3.msra.mxu0 %v106_v40  ;;  %714 = vmatpush3.msra.mxu1 %v441_v52 }
  0x51   :  { %356 = vmatmul.mubr.f32.vlgmr.msra.gmra.mxu0 %v39_v41  ;;  %715 = vmatprep.subr.mxu1 %v789_v14 }
  0x52   :  { %716 = vmatpush3.msra.mxu1 %v440_v53 }
  0x53   :  { %717 = vmatprep.subr.mxu1 %v789_v14 }
  0x54   :  { %718 = vmatpush3.msra.mxu1 %v439_v54 }
  0x55   :  { %719 = vmatprep.subr.mxu1 %v789_v14 }
  0x56   :  { %720 = vmatpush3.msra.mxu1 %v438_v55 }
  0x57   :  { %721 = vmatprep.subr.mxu1 %v789_v14 }
  0x58   :  { %722 = vmatpush3.msra.mxu1 %v437_v56 }
  0x59   :  { %723 = vmatprep.subr.mxu1 %v789_v14 }
  0x5a   :  { %724 = vmatpush3.msra.mxu1 %v436_v57 }
  0xef   :  { %v593_v62 = vpop.f32.mrf.mxu0 }
  0xf1   :  { %v594_v63 = vpop.f32.mrf.mxu0 }
  0xf2   :  { %v628_v58 = vpop.f32.mrf.mxu1  ;;  %v595_v0 = vadd.f32 %v594_v63, %v593_v62 }
  0xf4   :  { %v629_v59 = vpop.f32.mrf.mxu1  ;;  %v218_v2 = vadd.f32 %v595_v0, %v558_v1 }
  0xf5   :  { %v630_v3 = vadd.f32 %v629_v59, %v628_v58 }
  0xf7   :  { %v288_v6 = vadd.f32 %v630_v3, %v218_v2 }
  0xf9   :  { %v427_v60 = vpop.f32.mrf.mxu1 }
  0xfb   :  { %v692_v61 = vpop.f32.mrf.mxu1 }
 0x111   :  { %v663_v4 = vpop.f32.mrf.mxu0 }
 0x113   :  { %v664_v5 = vpop.f32.mrf.mxu0 }
 0x114   :  { %v665_v7 = vadd.f32 %v664_v5, %v663_v4 }
 0x116   :  { %v358_v8 = vadd.f32 %v665_v7, %v288_v6 }
 0x118   :  { %v428_v9 = vadd.f32 %v427_v60, %v358_v8 }
 0x11a   :  { %v431_v10 = vsub.f32 0.0, %v428_v9 }
 0x11c   :  { %v432_v11 = vmul.f32 1.442695, %v431_v10 }
 0x11e   :  { %734 = vpow2.f32 %v432_v11 }
 0x12b   :  { %v735_v12 = vpop.eup %734 }
 0x12c   :  { %v434_v13 = vadd.f32 1.0, %v735_v12 }
 0x12e   :  { %736 = vrcp.f32 %v434_v13 }
 0x13b   :  { %v737_v14 = vpop.eup %736 }
 0x13c   :  { %726 = vmatmul.mubr.f32.vlgmr.msra.gmra.mxu1 %v737_v14 }
 0x1fc   :  { %v525_v16 = vpop.f32.mrf.mxu1 }
 0x1fd   :  { %v526_v17 = vadd.f32 %v560_v15, %v525_v16 }
 0x1fe   :  { %v727_v18 = vpop.f32.mrf.mxu1 }
 0x1ff   :  { %v530_v19 = vsel %vm529_vm2, %v526_v17, -inf }
 0x200   :  { %531 = vmax.xlane.f32.xlu0 %v530_v19 }
 0x289   :  { %v532_v20 = vpop.xlane.xlu0 %531 }
 0x28a   :  { %v533_v21 = vsub.f32 %v526_v17, %v532_v20 }
 0x28c   :  { %v534_v22 = vmul.f32 1.442695, %v533_v21 }
 0x28e   :  { %738 = vpow2.f32 %v534_v22 }
 0x29b   :  { %v739_v23 = vpop.eup %738 }
 0x29c   :  { %v536_v24 = vsel %vm529_vm2, %v739_v23, 0.0 }
 0x29d   :  { %537 = vadd.xlane.f32.xlu0 %v536_v24 }
 0x326   :  { %v538_v25 = vpop.xlane.xlu0 %537 }
 0x327   :  { %740 = vlog2.f32 %v538_v25 }
 0x334   :  { %v741_v26 = vpop.eup %740 }
 0x335   :  { %v540_v27 = vmul.f32 0.6931472, %v741_v26 }
 0x337   :  { %v541_v28 = vsub.f32 %v533_v21, %v540_v27 }
 0x339   :  { %542 = vst.msk [vmem:[#allocation5] sm:$0xff] %vm529_vm2, %v541_v28 }
 0x33a   :  { %773 = shalt.err (!%p770_p9)
}
 0x33b   :  { %552 = dma.vmem_to_hbm [thread:$0]  %s550_s4, 128, %s931_s5, [#allocation4]  }
 0x33c   :  { %784 = dma.done.wait [#allocation4], 128  }
 0x33d   :  { %785 = vsyncadd [#allocation4], 4294967168 }
 0x33e   :  { %556 = vsyncpa [#allocation3], 1 }
 0x33f   :  { %557 = vsyncpa [#allocation4], 1 }

</bundles_post_ra>
